<compile_context>
chip_gen: v7x
topology: tpu7x:2x2x1
jax: 0.10.0
libtpu: 0.0.40
codegen_flags: <defaults>
</compile_context>

<pallas_src>
import functools

import jax
import jax.numpy as jnp
from jax.experimental import pallas as pl
from jax.experimental.pallas import tpu as pltpu


def _round_up(a, m):
    return ((a + m - 1) // m) * m


def _num_tensorcores():
    """Best-effort TensorCores-per-chip (2 on v4/v5p/v7x, 1 on v5e/v6e)."""
    try:
        kind = jax.devices()[0].device_kind.lower()
    except Exception:
        return 1
    if "lite" in kind or "v5e" in kind or "v6" in kind or "v2" in kind or "v3" in kind:
        return 1
    if "v4" in kind or "v5p" in kind or "v7" in kind:
        return 2
    return 1


def _gnn_lin_kernel(x_ref, wmx_ref, wcol_ref, out_ref, *, dims, offs):
    """Fused 5x(Linear+ReLU) -> Linear head for one lane-tile of nodes.

    x_ref:    (2, tile)        nodes on lanes, the two input features on sublanes
    wmx_ref:  (H_PAD+HQ_PAD,H) bf16 slab: conv2 rows [0:H_PAD), conv3 rows after
    wcol_ref: (R, 1)           f32 slab of column vectors (conv1/conv4/conv5/head
                               weights and all biases), 8-row aligned offsets
    out_ref:  (1, tile)        lane-dense head output
    """
    H, HQ, OC, H_PAD, HQ_PAD = dims
    (o_w1a, o_w1b, o_b1, o_b2, o_b3, o_b4, o_b5, o_wl, o_bl,
     o_w4, o_w5, s_w4, s_w5) = offs

    def col(off, n):
        return wcol_ref[off:off + n, :]                 # (n, 1) f32, static slice

    x = x_ref[...]                                      # (2, tile) f32

    # conv1 (K = 2): two VPU broadcast FMAs, no MXU.
    h = col(o_w1a, H) * x[0:1, :] + col(o_w1b, H) * x[1:2, :] + col(o_b1, H)
    h = jnp.maximum(h, 0.0)                             # (H, tile) f32

    # conv2 (H -> H) on the MXU: bf16 inputs, f32 accumulation.
    y = jnp.dot(wmx_ref[0:H_PAD, :], h.astype(jnp.bfloat16),
                preferred_element_type=jnp.float32)     # (H_PAD, tile)
    h = jnp.maximum(y[0:H, :] + col(o_b2, H), 0.0)      # (H, tile)

    # conv3 (H -> HQ) on the MXU: bf16 inputs, f32 accumulation.
    y = jnp.dot(wmx_ref[H_PAD:H_PAD + HQ_PAD, :], h.astype(jnp.bfloat16),
                preferred_element_type=jnp.float32)     # (HQ_PAD, tile)
    h = jnp.maximum(y[0:HQ, :] + col(o_b3, HQ), 0.0)    # (HQ, tile)

    # conv4 (HQ -> HQ): VPU broadcast FMAs (MXU is latency-bound at K=M<=8).
    y = col(o_b4, HQ)
    for k in range(HQ):
        y = y + col(o_w4 + k * s_w4, HQ) * h[k:k + 1, :]
    h = jnp.maximum(y, 0.0)                             # (HQ, tile)

    # conv5 (HQ -> OC): VPU broadcast FMAs.
    y = col(o_b5, OC)
    for k in range(HQ):
        y = y + col(o_w5 + k * s_w5, OC) * h[k:k + 1, :]
    h = jnp.maximum(y, 0.0)                             # (OC, tile)

    # F.dropout(x, training=False) is the identity (eval-mode semantics).
    # TODO(synk): training-mode dropout (random mask + 1/(1-p) scaling) not implemented.

    # Head (OC -> 1): elementwise multiply + sublane reduce, lane-dense store.
    out = jnp.sum(col(o_wl, OC) * h, axis=0, keepdims=True) + col(o_bl, 1)
    out_ref[...] = out.astype(out_ref.dtype)


def _pack_columns(vectors):
    """Stack 1-D vectors along sublanes into one (R, 1) f32 slab, 8-aligned."""
    cols, offs, r = [], [], 0
    for v in vectors:
        v = v.reshape(-1, 1).astype(jnp.float32)
        n = v.shape[0]
        n_pad = _round_up(n, 8)
        if n_pad != n:
            v = jnp.pad(v, ((0, n_pad - n), (0, 0)))
        offs.append(r)
        cols.append(v)
        r += n_pad
    return jnp.concatenate(cols, axis=0), offs


def _prepare_params(params):
    """Pack PyTorch-layout Linear params into the two kernel slabs."""
    w1, b1, w2, b2, w3, b3, w4, b4, w5, b5, wl, bl = params
    H, HQ, OC = w1.shape[0], w3.shape[0], w5.shape[0]
    H_PAD, HQ_PAD = _round_up(H, 16), _round_up(HQ, 16)   # bf16 sublane tile = 16

    def pad_rows(w, rows):
        w = w.astype(jnp.float32)
        return jnp.pad(w, ((0, rows - w.shape[0]), (0, 0)))

    # bf16 MXU slab: conv2 on rows [0:H_PAD), conv3 on rows [H_PAD:H_PAD+HQ_PAD).
    wmx = jnp.concatenate([pad_rows(w2, H_PAD), pad_rows(w3, HQ_PAD)],
                          axis=0).astype(jnp.bfloat16)

    # f32 column slab for the VPU layers / biases / head.
    s_w4 = _round_up(HQ, 8)
    s_w5 = _round_up(OC, 8)
    vectors = [w1[:, 0], w1[:, 1], b1, b2, b3, b4, b5, wl[0, :], bl]
    vectors += [w4[:, k] for k in range(HQ)]            # conv4 columns
    vectors += [w5[:, k] for k in range(HQ)]            # conv5 columns
    wcol, offs = _pack_columns(vectors)

    offsets = tuple(offs[:9]) + (offs[9], offs[9 + HQ], s_w4, s_w5)
    dims = (H, HQ, OC, H_PAD, HQ_PAD)
    return wmx, wcol, dims, offsets


def gnn_lin_forward(x, params, batch_size, *, tile_n=4096):
    """GNN_LIN.forward: x flattens to (-1, 2); returns (batch_size, N // batch_size)."""
    x2 = x.reshape(-1, 2).astype(jnp.float32)            # node-major, like x.view(-1, 2)
    n_nodes = x2.shape[0]

    # Lane-tile selection: large, multiple of 256.  Halve (so both cores get a
    # step) only on chips that actually have 2 TensorCores; keep the padded
    # grid length a multiple of the core count on those chips.
    n_tc = _num_tensorcores()
    tile_n = max(256, _round_up(tile_n, 256))
    tile = min(tile_n, _round_up(n_nodes, 256))
    if n_tc >= 2:
        if _round_up(n_nodes, tile) == tile and tile >= 512:
            tile = _round_up(tile // 2, 256)
        n_pad = _round_up(n_nodes, tile * n_tc)
    else:
        n_pad = _round_up(n_nodes, tile)
    grid = (n_pad // tile,)

    # Transposed, node-on-lanes layout.  Kept inside the caller's jit so the
    # transpose + pad fuse with the producer (no standalone HBM round trip).
    xt = x2.T                                            # (2, N)
    if n_pad != n_nodes:
        xt = jnp.pad(xt, ((0, 0), (0, n_pad - n_nodes)))

    wmx, wcol, dims, offs = _prepare_params(params)
    kernel = functools.partial(_gnn_lin_kernel, dims=dims, offs=offs)

    out = pl.pallas_call(
        kernel,
        out_shape=jax.ShapeDtypeStruct((1, n_pad), jnp.float32),
        grid=grid,
        in_specs=[pl.BlockSpec((2, tile), lambda i: (0, i)),
                  pl.BlockSpec(wmx.shape, lambda i: (0, 0)),     # grid-invariant slab
                  pl.BlockSpec(wcol.shape, lambda i: (0, 0))],   # grid-invariant slab
        out_specs=pl.BlockSpec((1, tile), lambda i: (0, i)),
        compiler_params=pltpu.CompilerParams(
            dimension_semantics=("parallel",)),
    )(xt, wmx, wcol)

    # Same divisibility assumption as torch's x.view(batch_size, -1).
    return out[0, :n_nodes].reshape(batch_size, -1)


def init_params(key, in_channels, hidden_channels, out_channels):
    """PyTorch-Linear-style init: weights in [out, in] layout, 1-D biases."""
    hq = hidden_channels // 4
    dims = [
        (in_channels, hidden_channels),      # conv1
        (hidden_channels, hidden_channels),  # conv2
        (hidden_channels, hq),               # conv3
        (hq, hq),                            # conv4
        (hq, out_channels),                  # conv5
        (out_channels, 1),                   # lin
    ]
    params = []
    for fan_in, fan_out in dims:
        key, kw, kb = jax.random.split(key, 3)
        bound = 1.0 / jnp.sqrt(jnp.float32(fan_in))
        w = jax.random.uniform(kw, (fan_out, fan_in), jnp.float32, -bound, bound)
        b = jax.random.uniform(kb, (fan_out,), jnp.float32, -bound, bound)
        params.extend([w, b])
    return tuple(params)


def ref_forward(x, params, batch_size):
    """Pure-JAX f32 reference (node-major, PyTorch semantics)."""
    h = x.reshape(-1, 2).astype(jnp.float32)
    w1, b1, w2, b2, w3, b3, w4, b4, w5, b5, wl, bl = params
    for w, b in ((w1, b1), (w2, b2), (w3, b3), (w4, b4), (w5, b5)):
        h = jnp.maximum(h @ w.T + b, 0.0)
    y = h @ wl.T + bl
    return y.reshape(batch_size, -1)


if __name__ == "__main__":
    in_channels = 2          # forward does x.view(-1, 2)
    hidden_channels = 32
    out_channels = 4

    batch_size = 2
    nodes_per_graph = 8
    n_nodes = batch_size * nodes_per_graph               # 16 nodes total

    key = jax.random.PRNGKey(0)
    key, kx = jax.random.split(key)
    x = jax.random.normal(kx, (n_nodes, in_channels), jnp.float32)
    # edge_index is unused by GNN_LIN.forward (kept for signature parity)
    edge_index = jnp.zeros((2, 4), jnp.int32)

    params = init_params(key, in_channels, hidden_channels, out_channels)

    fwd = jax.jit(gnn_lin_forward, static_argnames=("batch_size", "tile_n"))
    out = jax.block_until_ready(fwd(x, params, batch_size=batch_size))
    assert out.shape == (batch_size, nodes_per_graph)

    ref = ref_forward(x, params, batch_size)
    # bf16 MXU inputs (with f32 accumulation) -> tolerance loosened vs f32 reference.
    assert jnp.allclose(out, ref, atol=3e-2, rtol=3e-2), "mismatch vs reference"

    print("KERNEL_OK")
</pallas_src>

<mosaic_0001>
module attributes {stable_mosaic.version = 11 : i64} {
  func.func @_gnn_lin_kernel(%arg0: i32, %arg1: memref<2x256xf32, #tpu.memory_space<vmem>>, %arg2: memref<48x32xbf16, #tpu.memory_space<vmem>>, %arg3: memref<296x1xf32, #tpu.memory_space<vmem>>, %arg4: memref<1x256xf32, #tpu.memory_space<vmem>>) attributes {dimension_semantics = [#tpu.dimension_semantics<parallel>], iteration_bounds = array<i64: 1>, scalar_prefetch = 0 : i64, scratch_operands = 0 : i64, tpu.core_type = #tpu.core_type<tc>, window_params = [{transform_indices = @transform_0, window_bounds = array<i64: 2, 256>}, {pipeline_mode = #tpu.pipeline_mode<synchronous>, transform_indices = @transform_1, window_bounds = array<i64: 48, 32>}, {pipeline_mode = #tpu.pipeline_mode<synchronous>, transform_indices = @transform_2, window_bounds = array<i64: 296, 1>}, {transform_indices = @transform_3, window_bounds = array<i64: 1, 256>}]} {
    %c0 = arith.constant 0 : index
    %c0_0 = arith.constant 0 : index
    %0 = vector.load %arg1[%c0, %c0_0] : memref<2x256xf32, #tpu.memory_space<vmem>>, vector<2x256xf32>
    %c0_1 = arith.constant 0 : index
    %c0_2 = arith.constant 0 : index
    %1 = vector.load %arg3[%c0_1, %c0_2] : memref<296x1xf32, #tpu.memory_space<vmem>>, vector<32x1xf32>
    %2 = vector.extract_strided_slice %0 {offsets = [0, 0], sizes = [1, 256], strides = [1, 1]} : vector<2x256xf32> to vector<1x256xf32>
    %3 = vector.broadcast %1 : vector<32x1xf32> to vector<32x256xf32>
    %4 = vector.broadcast %2 : vector<1x256xf32> to vector<32x256xf32>
    %5 = arith.mulf %3, %4 : vector<32x256xf32>
    %c32 = arith.constant 32 : index
    %c0_3 = arith.constant 0 : index
    %6 = vector.load %arg3[%c32, %c0_3] : memref<296x1xf32, #tpu.memory_space<vmem>>, vector<32x1xf32>
    %7 = vector.extract_strided_slice %0 {offsets = [1, 0], sizes = [1, 256], strides = [1, 1]} : vector<2x256xf32> to vector<1x256xf32>
    %8 = vector.broadcast %6 : vector<32x1xf32> to vector<32x256xf32>
    %9 = vector.broadcast %7 : vector<1x256xf32> to vector<32x256xf32>
    %10 = arith.mulf %8, %9 : vector<32x256xf32>
    %11 = arith.addf %5, %10 : vector<32x256xf32>
    %c64 = arith.constant 64 : index
    %c0_4 = arith.constant 0 : index
    %12 = vector.load %arg3[%c64, %c0_4] : memref<296x1xf32, #tpu.memory_space<vmem>>, vector<32x1xf32>
    %13 = vector.broadcast %12 : vector<32x1xf32> to vector<32x256xf32>
    %14 = arith.addf %11, %13 : vector<32x256xf32>
    %cst = arith.constant 0.000000e+00 : f32
    %15 = vector.broadcast %cst : f32 to vector<32x256xf32>
    %16 = arith.maximumf %14, %15 : vector<32x256xf32>
    %c0_5 = arith.constant 0 : index
    %c0_6 = arith.constant 0 : index
    %17 = vector.load %arg2[%c0_5, %c0_6] : memref<48x32xbf16, #tpu.memory_space<vmem>>, vector<32x32xbf16>
    %18 = arith.truncf %16 : vector<32x256xf32> to vector<32x256xbf16>
    %cst_7 = arith.constant dense<0.000000e+00> : vector<32x256xf32>
    %19 = tpu.matmul %17, %18, %cst_7 {dimension_numbers = #tpu.dot_dimension_numbers<[1], [0], [0], [1], [0, 0, 1, 1], [], []>} : vector<32x32xbf16>, vector<32x256xbf16>, vector<32x256xf32> -> vector<32x256xf32>
    %c96 = arith.constant 96 : index
    %c0_8 = arith.constant 0 : index
    %20 = vector.load %arg3[%c96, %c0_8] : memref<296x1xf32, #tpu.memory_space<vmem>>, vector<32x1xf32>
    %21 = vector.broadcast %20 : vector<32x1xf32> to vector<32x256xf32>
    %22 = arith.addf %19, %21 : vector<32x256xf32>
    %cst_9 = arith.constant 0.000000e+00 : f32
    %23 = vector.broadcast %cst_9 : f32 to vector<32x256xf32>
    %24 = arith.maximumf %22, %23 : vector<32x256xf32>
    %c32_10 = arith.constant 32 : index
    %c0_11 = arith.constant 0 : index
    %25 = vector.load %arg2[%c32_10, %c0_11] : memref<48x32xbf16, #tpu.memory_space<vmem>>, vector<16x32xbf16>
    %26 = arith.truncf %24 : vector<32x256xf32> to vector<32x256xbf16>
    %cst_12 = arith.constant dense<0.000000e+00> : vector<16x256xf32>
    %27 = tpu.matmul %25, %26, %cst_12 {dimension_numbers = #tpu.dot_dimension_numbers<[1], [0], [0], [1], [0, 0, 1, 1], [], []>} : vector<16x32xbf16>, vector<32x256xbf16>, vector<16x256xf32> -> vector<16x256xf32>
    %28 = vector.extract_strided_slice %27 {offsets = [0, 0], sizes = [8, 256], strides = [1, 1]} : vector<16x256xf32> to vector<8x256xf32>
    %c128 = arith.constant 128 : index
    %c0_13 = arith.constant 0 : index
    %29 = vector.load %arg3[%c128, %c0_13] : memref<296x1xf32, #tpu.memory_space<vmem>>, vector<8x1xf32>
    %30 = vector.broadcast %29 : vector<8x1xf32> to vector<8x256xf32>
    %31 = arith.addf %28, %30 : vector<8x256xf32>
    %cst_14 = arith.constant 0.000000e+00 : f32
    %32 = vector.broadcast %cst_14 : f32 to vector<8x256xf32>
    %33 = arith.maximumf %31, %32 : vector<8x256xf32>
    %c136 = arith.constant 136 : index
    %c0_15 = arith.constant 0 : index
    %34 = vector.load %arg3[%c136, %c0_15] : memref<296x1xf32, #tpu.memory_space<vmem>>, vector<8x1xf32>
    %c168 = arith.constant 168 : index
    %c0_16 = arith.constant 0 : index
    %35 = vector.load %arg3[%c168, %c0_16] : memref<296x1xf32, #tpu.memory_space<vmem>>, vector<8x1xf32>
    %36 = vector.extract_strided_slice %33 {offsets = [0, 0], sizes = [1, 256], strides = [1, 1]} : vector<8x256xf32> to vector<1x256xf32>
    %37 = vector.broadcast %35 : vector<8x1xf32> to vector<8x256xf32>
    %38 = vector.broadcast %36 : vector<1x256xf32> to vector<8x256xf32>
    %39 = arith.mulf %37, %38 : vector<8x256xf32>
    %40 = vector.broadcast %34 : vector<8x1xf32> to vector<8x256xf32>
    %41 = arith.addf %40, %39 : vector<8x256xf32>
    %c176 = arith.constant 176 : index
    %c0_17 = arith.constant 0 : index
    %42 = vector.load %arg3[%c176, %c0_17] : memref<296x1xf32, #tpu.memory_space<vmem>>, vector<8x1xf32>
    %43 = vector.extract_strided_slice %33 {offsets = [1, 0], sizes = [1, 256], strides = [1, 1]} : vector<8x256xf32> to vector<1x256xf32>
    %44 = vector.broadcast %42 : vector<8x1xf32> to vector<8x256xf32>
    %45 = vector.broadcast %43 : vector<1x256xf32> to vector<8x256xf32>
    %46 = arith.mulf %44, %45 : vector<8x256xf32>
    %47 = arith.addf %41, %46 : vector<8x256xf32>
    %c184 = arith.constant 184 : index
    %c0_18 = arith.constant 0 : index
    %48 = vector.load %arg3[%c184, %c0_18] : memref<296x1xf32, #tpu.memory_space<vmem>>, vector<8x1xf32>
    %49 = vector.extract_strided_slice %33 {offsets = [2, 0], sizes = [1, 256], strides = [1, 1]} : vector<8x256xf32> to vector<1x256xf32>
    %50 = vector.broadcast %48 : vector<8x1xf32> to vector<8x256xf32>
    %51 = vector.broadcast %49 : vector<1x256xf32> to vector<8x256xf32>
    %52 = arith.mulf %50, %51 : vector<8x256xf32>
    %53 = arith.addf %47, %52 : vector<8x256xf32>
    %c192 = arith.constant 192 : index
    %c0_19 = arith.constant 0 : index
    %54 = vector.load %arg3[%c192, %c0_19] : memref<296x1xf32, #tpu.memory_space<vmem>>, vector<8x1xf32>
    %55 = vector.extract_strided_slice %33 {offsets = [3, 0], sizes = [1, 256], strides = [1, 1]} : vector<8x256xf32> to vector<1x256xf32>
    %56 = vector.broadcast %54 : vector<8x1xf32> to vector<8x256xf32>
    %57 = vector.broadcast %55 : vector<1x256xf32> to vector<8x256xf32>
    %58 = arith.mulf %56, %57 : vector<8x256xf32>
    %59 = arith.addf %53, %58 : vector<8x256xf32>
    %c200 = arith.constant 200 : index
    %c0_20 = arith.constant 0 : index
    %60 = vector.load %arg3[%c200, %c0_20] : memref<296x1xf32, #tpu.memory_space<vmem>>, vector<8x1xf32>
    %61 = vector.extract_strided_slice %33 {offsets = [4, 0], sizes = [1, 256], strides = [1, 1]} : vector<8x256xf32> to vector<1x256xf32>
    %62 = vector.broadcast %60 : vector<8x1xf32> to vector<8x256xf32>
    %63 = vector.broadcast %61 : vector<1x256xf32> to vector<8x256xf32>
    %64 = arith.mulf %62, %63 : vector<8x256xf32>
    %65 = arith.addf %59, %64 : vector<8x256xf32>
    %c208 = arith.constant 208 : index
    %c0_21 = arith.constant 0 : index
    %66 = vector.load %arg3[%c208, %c0_21] : memref<296x1xf32, #tpu.memory_space<vmem>>, vector<8x1xf32>
    %67 = vector.extract_strided_slice %33 {offsets = [5, 0], sizes = [1, 256], strides = [1, 1]} : vector<8x256xf32> to vector<1x256xf32>
    %68 = vector.broadcast %66 : vector<8x1xf32> to vector<8x256xf32>
    %69 = vector.broadcast %67 : vector<1x256xf32> to vector<8x256xf32>
    %70 = arith.mulf %68, %69 : vector<8x256xf32>
    %71 = arith.addf %65, %70 : vector<8x256xf32>
    %c216 = arith.constant 216 : index
    %c0_22 = arith.constant 0 : index
    %72 = vector.load %arg3[%c216, %c0_22] : memref<296x1xf32, #tpu.memory_space<vmem>>, vector<8x1xf32>
    %73 = vector.extract_strided_slice %33 {offsets = [6, 0], sizes = [1, 256], strides = [1, 1]} : vector<8x256xf32> to vector<1x256xf32>
    %74 = vector.broadcast %72 : vector<8x1xf32> to vector<8x256xf32>
    %75 = vector.broadcast %73 : vector<1x256xf32> to vector<8x256xf32>
    %76 = arith.mulf %74, %75 : vector<8x256xf32>
    %77 = arith.addf %71, %76 : vector<8x256xf32>
    %c224 = arith.constant 224 : index
    %c0_23 = arith.constant 0 : index
    %78 = vector.load %arg3[%c224, %c0_23] : memref<296x1xf32, #tpu.memory_space<vmem>>, vector<8x1xf32>
    %79 = vector.extract_strided_slice %33 {offsets = [7, 0], sizes = [1, 256], strides = [1, 1]} : vector<8x256xf32> to vector<1x256xf32>
    %80 = vector.broadcast %78 : vector<8x1xf32> to vector<8x256xf32>
    %81 = vector.broadcast %79 : vector<1x256xf32> to vector<8x256xf32>
    %82 = arith.mulf %80, %81 : vector<8x256xf32>
    %83 = arith.addf %77, %82 : vector<8x256xf32>
    %cst_24 = arith.constant 0.000000e+00 : f32
    %84 = vector.broadcast %cst_24 : f32 to vector<8x256xf32>
    %85 = arith.maximumf %83, %84 : vector<8x256xf32>
    %c144 = arith.constant 144 : index
    %c0_25 = arith.constant 0 : index
    %86 = vector.load %arg3[%c144, %c0_25] : memref<296x1xf32, #tpu.memory_space<vmem>>, vector<4x1xf32>
    %c232 = arith.constant 232 : index
    %c0_26 = arith.constant 0 : index
    %87 = vector.load %arg3[%c232, %c0_26] : memref<296x1xf32, #tpu.memory_space<vmem>>, vector<4x1xf32>
    %88 = vector.extract_strided_slice %85 {offsets = [0, 0], sizes = [1, 256], strides = [1, 1]} : vector<8x256xf32> to vector<1x256xf32>
    %89 = vector.broadcast %87 : vector<4x1xf32> to vector<4x256xf32>
    %90 = vector.broadcast %88 : vector<1x256xf32> to vector<4x256xf32>
    %91 = arith.mulf %89, %90 : vector<4x256xf32>
    %92 = vector.broadcast %86 : vector<4x1xf32> to vector<4x256xf32>
    %93 = arith.addf %92, %91 : vector<4x256xf32>
    %c240 = arith.constant 240 : index
    %c0_27 = arith.constant 0 : index
    %94 = vector.load %arg3[%c240, %c0_27] : memref<296x1xf32, #tpu.memory_space<vmem>>, vector<4x1xf32>
    %95 = vector.extract_strided_slice %85 {offsets = [1, 0], sizes = [1, 256], strides = [1, 1]} : vector<8x256xf32> to vector<1x256xf32>
    %96 = vector.broadcast %94 : vector<4x1xf32> to vector<4x256xf32>
    %97 = vector.broadcast %95 : vector<1x256xf32> to vector<4x256xf32>
    %98 = arith.mulf %96, %97 : vector<4x256xf32>
    %99 = arith.addf %93, %98 : vector<4x256xf32>
    %c248 = arith.constant 248 : index
    %c0_28 = arith.constant 0 : index
    %100 = vector.load %arg3[%c248, %c0_28] : memref<296x1xf32, #tpu.memory_space<vmem>>, vector<4x1xf32>
    %101 = vector.extract_strided_slice %85 {offsets = [2, 0], sizes = [1, 256], strides = [1, 1]} : vector<8x256xf32> to vector<1x256xf32>
    %102 = vector.broadcast %100 : vector<4x1xf32> to vector<4x256xf32>
    %103 = vector.broadcast %101 : vector<1x256xf32> to vector<4x256xf32>
    %104 = arith.mulf %102, %103 : vector<4x256xf32>
    %105 = arith.addf %99, %104 : vector<4x256xf32>
    %c256 = arith.constant 256 : index
    %c0_29 = arith.constant 0 : index
    %106 = vector.load %arg3[%c256, %c0_29] : memref<296x1xf32, #tpu.memory_space<vmem>>, vector<4x1xf32>
    %107 = vector.extract_strided_slice %85 {offsets = [3, 0], sizes = [1, 256], strides = [1, 1]} : vector<8x256xf32> to vector<1x256xf32>
    %108 = vector.broadcast %106 : vector<4x1xf32> to vector<4x256xf32>
    %109 = vector.broadcast %107 : vector<1x256xf32> to vector<4x256xf32>
    %110 = arith.mulf %108, %109 : vector<4x256xf32>
    %111 = arith.addf %105, %110 : vector<4x256xf32>
    %c264 = arith.constant 264 : index
    %c0_30 = arith.constant 0 : index
    %112 = vector.load %arg3[%c264, %c0_30] : memref<296x1xf32, #tpu.memory_space<vmem>>, vector<4x1xf32>
    %113 = vector.extract_strided_slice %85 {offsets = [4, 0], sizes = [1, 256], strides = [1, 1]} : vector<8x256xf32> to vector<1x256xf32>
    %114 = vector.broadcast %112 : vector<4x1xf32> to vector<4x256xf32>
    %115 = vector.broadcast %113 : vector<1x256xf32> to vector<4x256xf32>
    %116 = arith.mulf %114, %115 : vector<4x256xf32>
    %117 = arith.addf %111, %116 : vector<4x256xf32>
    %c272 = arith.constant 272 : index
    %c0_31 = arith.constant 0 : index
    %118 = vector.load %arg3[%c272, %c0_31] : memref<296x1xf32, #tpu.memory_space<vmem>>, vector<4x1xf32>
    %119 = vector.extract_strided_slice %85 {offsets = [5, 0], sizes = [1, 256], strides = [1, 1]} : vector<8x256xf32> to vector<1x256xf32>
    %120 = vector.broadcast %118 : vector<4x1xf32> to vector<4x256xf32>
    %121 = vector.broadcast %119 : vector<1x256xf32> to vector<4x256xf32>
    %122 = arith.mulf %120, %121 : vector<4x256xf32>
    %123 = arith.addf %117, %122 : vector<4x256xf32>
    %c280 = arith.constant 280 : index
    %c0_32 = arith.constant 0 : index
    %124 = vector.load %arg3[%c280, %c0_32] : memref<296x1xf32, #tpu.memory_space<vmem>>, vector<4x1xf32>
    %125 = vector.extract_strided_slice %85 {offsets = [6, 0], sizes = [1, 256], strides = [1, 1]} : vector<8x256xf32> to vector<1x256xf32>
    %126 = vector.broadcast %124 : vector<4x1xf32> to vector<4x256xf32>
    %127 = vector.broadcast %125 : vector<1x256xf32> to vector<4x256xf32>
    %128 = arith.mulf %126, %127 : vector<4x256xf32>
    %129 = arith.addf %123, %128 : vector<4x256xf32>
    %c288 = arith.constant 288 : index
    %c0_33 = arith.constant 0 : index
    %130 = vector.load %arg3[%c288, %c0_33] : memref<296x1xf32, #tpu.memory_space<vmem>>, vector<4x1xf32>
    %131 = vector.extract_strided_slice %85 {offsets = [7, 0], sizes = [1, 256], strides = [1, 1]} : vector<8x256xf32> to vector<1x256xf32>
    %132 = vector.broadcast %130 : vector<4x1xf32> to vector<4x256xf32>
    %133 = vector.broadcast %131 : vector<1x256xf32> to vector<4x256xf32>
    %134 = arith.mulf %132, %133 : vector<4x256xf32>
    %135 = arith.addf %129, %134 : vector<4x256xf32>
    %cst_34 = arith.constant 0.000000e+00 : f32
    %136 = vector.broadcast %cst_34 : f32 to vector<4x256xf32>
    %137 = arith.maximumf %135, %136 : vector<4x256xf32>
    %c152 = arith.constant 152 : index
    %c0_35 = arith.constant 0 : index
    %138 = vector.load %arg3[%c152, %c0_35] : memref<296x1xf32, #tpu.memory_space<vmem>>, vector<4x1xf32>
    %139 = vector.broadcast %138 : vector<4x1xf32> to vector<4x256xf32>
    %140 = arith.mulf %139, %137 : vector<4x256xf32>
    %cst_36 = arith.constant dense<0.000000e+00> : vector<256xf32>
    %141 = vector.multi_reduction <add>, %140, %cst_36 [0] : vector<4x256xf32> to vector<256xf32>
    %142 = vector.shape_cast %141 : vector<256xf32> to vector<1x256xf32>
    %c160 = arith.constant 160 : index
    %c0_37 = arith.constant 0 : index
    %143 = vector.load %arg3[%c160, %c0_37] : memref<296x1xf32, #tpu.memory_space<vmem>>, vector<1x1xf32>
    %144 = vector.broadcast %143 : vector<1x1xf32> to vector<1x256xf32>
    %145 = arith.addf %142, %144 : vector<1x256xf32>
    %c0_38 = arith.constant 0 : index
    %c0_39 = arith.constant 0 : index
    %146 = vector.load %arg4[%c0_38, %c0_39] : memref<1x256xf32, #tpu.memory_space<vmem>>, vector<1x256xf32>
    tpu.vector_store %arg4[%c0_38, %c0_39], %145 {strides = array<i32>} : memref<1x256xf32, #tpu.memory_space<vmem>>, vector<1x256xf32>,
    return
  }
  func.func @transform_0(%arg0: i32) -> (i32, i32) {
    %c0_i32 = arith.constant 0 : i32
    %c0_i32_0 = arith.constant 0 : i32
    return %c0_i32, %arg0 : i32, i32
  }
  func.func @transform_1(%arg0: i32) -> (i32, i32) {
    %c0_i32 = arith.constant 0 : i32
    %c0_i32_0 = arith.constant 0 : i32
    %c0_i32_1 = arith.constant 0 : i32
    return %c0_i32, %c0_i32_0 : i32, i32
  }
  func.func @transform_2(%arg0: i32) -> (i32, i32) {
    %c0_i32 = arith.constant 0 : i32
    %c0_i32_0 = arith.constant 0 : i32
    %c0_i32_1 = arith.constant 0 : i32
    return %c0_i32, %c0_i32_0 : i32, i32
  }
  func.func @transform_3(%arg0: i32) -> (i32, i32) {
    %c0_i32 = arith.constant 0 : i32
    %c0_i32_0 = arith.constant 0 : i32
    return %c0_i32, %arg0 : i32, i32
  }
}

</mosaic_0001>

<bundles_post_ra>
// kernel: squeeze.3
= control target key start
LH: loop header
LB: loop body
LE: loop exit
PB: predicated region body
PF: predicated region fallthrough
CT: control target
= control target key end

     0   :  { %s85_s0 = inlined_call_operand.vmem [shape: f32[16], index: 0, kind: input, shape index: {}]   ;;  %s86_s1 = inlined_call_operand.hbm [shape: f32[2,8], index: 1, kind: output, shape index: {}]  }
   0x1   :  { %v5_v0 = vld [vmem:[%s85_s0] sm:$0x1] }
   0x2   :  { %2 = vsyncpa [#allocation1], 0  ;;  %6 = vst [vmem:[#allocation3] sm:$0x1] %v5_v0  ;;  %vm8_vm0 = vcmask 64512   ;;  %s58_s0 = smov 120  }
   0x3   :  { %s59_s8 = smov [#allocation0]  }
   0x4   :  { %s26_s9 = sshll.u32 %s59_s8, 4  ;;  %s27_s9 = int_to_ptr.vmem [resolvable:$true] %s26_s9 }
   0x5   :  { %s34_s10 = scalar_lea.vmem %s27_s9, 32  ;;  %p39_p1 = scmp.lt.s32.totalorder %s27_s9, %s27_s9 }
   0x6   :  { %p35_p0 = scmp.ne.s32.totalorder %s27_s9, %s34_s10  ;;  %p40_p2 = scmp.lt.s32.totalorder %s34_s10, %s34_s10 }
   0x8   :  { %p41_p3 = por %p40_p2, %p39_p1 }
   0x9   :  { %v10_v1 = vld [vmem:[#allocation3] sm:$0x1]  }
   0xa   :  { %v7_v2 = vld [vmem:[#allocation3] sm:$0x1]   ;;  %11 = vrot.lane.b32.xlu0 %v10_v1, %s58_s0  ;;  %p42_p4 = pnand %p41_p3, %p35_p0 }
   0xb   :  { %9 = vst.msk [vmem:[#allocation2] sm:$0x1] %vm8_vm0, %v7_v2  }
  0x7c   :  { %v12_v3 = vpop.permute.xlu0 %11  }
  0x7d   :  { %15 = vst.msk [vmem:[#allocation2 + $0x1] sm:$0x1] %vm8_vm0, %v12_v3  }
  0x84   :  { %v19_v4 = vld [vmem:[#allocation2] sm:$0x3] }
  0x85   :  { %21 = vst [vmem:[#allocation0] sm:$0x3] %v19_v4 }
  0x86   :  { %45 = shalt.err (!%p42_p4)
}
  0x87   :  { %s46_s13 = scalar_lea.hbm %s86_s1, 32 }
  0x88   :  { %p47_p5 = scmp.ne.s32.totalorder %s86_s1, %s46_s13  ;;  %p50_p6 = scmp.lt.u32.totalorder %s46_s13, %s86_s1 }
  0x8a   :  { %p52_p7 = pnand %p50_p6, %p47_p5 }
  0x8c   :  { %55 = shalt.err (!%p52_p7)
}
  0x8d   :  { %29 = dma.vmem_to_hbm [thread:$0]  %s27_s9, 32, %s86_s1, [#allocation1]  }
  0x8e   :  { %56 = dma.done.wait [#allocation1], 32  }
  0x8f   :  { %57 = vsyncadd [#allocation1], 4294967264 }
  0x90   :  { %31 = vsyncpa [#allocation1], 1 }

// kernel: gnn_lin_forward.1
= control target key start
LH: loop header
LB: loop body
LE: loop exit
PB: predicated region body
PF: predicated region fallthrough
CT: control target
= control target key end

     0   :  { %v715_v0 = vmov 0   ;;  %v41_v38 = vlaneseq  ;;  %vm207_vm0 = vcmask 261120   ;;  %vm652_vm1 = vcmask 1043456   ;;  %s950_s2 = inlined_call_operand.vmem [shape: f32[296,1], index: 2, kind: input, shape index: {}]   ;;  %s951_s1 = inlined_call_operand.vmem [shape: bf16[48,32], index: 1, kind: input, shape index: {}]   ;;  %s952_s0 = inlined_call_operand.vmem [shape: f32[2,256], index: 0, kind: input, shape index: {}]   ;;  %s953_s3 = inlined_call_operand.vmem [shape: f32[1,256], index: 3, kind: output, shape index: {}]  }
   0x1   :  { %711 = vset.pattern.permute.xlu1 %v715_v0  ;;  %710 = vset.pattern.permute.xlu0 %v715_v0  ;;  %v67_v1 = vld [vmem:[%s950_s2 + $0x20] sm:$0xff]  ;;  %v68_v3 = vld [vmem:[%s950_s2 + $0x28] sm:$0xff]  ;;  %v19_v5 = vld [vmem:[%s950_s2 + $0x18] sm:$0xff] }
   0x2   :  { %v16_v2 = vld [vmem:[%s950_s2] sm:$0xff]  ;;  %73 = vperm.xlu1 %711, %v67_v1   ;;  %v17_v4 = vld [vmem:[%s950_s2 + $0x8] sm:$0xff]  ;;  %246 = vmatprep.mubr.bf16.mxu0 %v715_v0  ;;  %v18_v6 = vld [vmem:[%s950_s2 + $0x10] sm:$0xff]  ;;  %v853_v39 = vshrl.u32 %v41_v38, 7  ;;  %vm695_vm2 = vcmp.lt.s32.totalorder %v41_v38, 256 }
   0x3   :  { %22 = vperm.xlu0 %710, %v16_v2   ;;  %321 = vmatprep.mubr.bf16.mxu1 %v715_v0  ;;  %v70_v7 = vld [vmem:[%s950_s2 + $0x38] sm:$0xff]  ;;  %v69_v8 = vld [vmem:[%s950_s2 + $0x30] sm:$0xff]  ;;  %v126_v9 = vld [vmem:[%s950_s2 + $0x48] sm:$0xff] }
   0x4   :  { %v125_v10 = vld [vmem:[%s950_s2 + $0x40] sm:$0xff]  ;;  %v128_v11 = vld [vmem:[%s950_s2 + $0x58] sm:$0xff]  ;;  %v127_v12 = vld [vmem:[%s950_s2 + $0x50] sm:$0xff]  ;;  %v856_v40 = vsub.s32 1, %v853_v39  ;;  %v859_v41 = vsub.s32 3, %v853_v39  ;;  %v862_v42 = vsub.s32 0, %v853_v39 }
   0x5   :  { %v174_v13 = vld [vmem:[%s950_s2 + $0x68] sm:$0xff]  ;;  %v173_v14 = vld [vmem:[%s950_s2 + $0x60] sm:$0xff]  ;;  %v176_v15 = vld [vmem:[%s950_s2 + $0x78] sm:$0xff]  ;;  %v865_v43 = vsub.s32 2, %v853_v39 }
   0x6   :  { %78 = vperm.xlu1 %711, %v68_v3   ;;  %v175_v16 = vld [vmem:[%s950_s2 + $0x70] sm:$0xff]  ;;  %v341_v17 = vld [vmem:[%s950_s2 + $0xa8] sm:$0xff]  ;;  %v330_v18 = vld [vmem:[%s950_s2 + $0x80] sm:$0xff] }
   0x7   :  { %27 = vperm.xlu0 %710, %v17_v4   ;;  %v364_v19 = vld [vmem:[%s950_s2 + $0xb0] sm:$0xff]  ;;  %v340_v20 = vld [vmem:[%s950_s2 + $0x88] sm:$0xff]  ;;  %v400_v21 = vld [vmem:[%s950_s2 + $0xc0] sm:$0xff] }
   0x8   :  { %v382_v22 = vld [vmem:[%s950_s2 + $0xb8] sm:$0xff]  ;;  %v436_v23 = vld [vmem:[%s950_s2 + $0xd0] sm:$0xff]  ;;  %v418_v24 = vld [vmem:[%s950_s2 + $0xc8] sm:$0xff] }
   0x9   :  { %v472_v25 = vld [vmem:[%s950_s2 + $0xe0] sm:$0xff]  ;;  %v454_v26 = vld [vmem:[%s950_s2 + $0xd8] sm:$0xff]  ;;  %v492_v27 = vld [vmem:[%s950_s2 + $0x90] sm:$0xf] }
   0xa   :  { %37 = vperm.xlu1 %711, %v19_v5   ;;  %v493_v28 = vld [vmem:[%s950_s2 + $0xe8] sm:$0xf]  ;;  %v534_v29 = vld [vmem:[%s950_s2 + $0xf8] sm:$0xf]  ;;  %v516_v30 = vld [vmem:[%s950_s2 + $0xf0] sm:$0xf] }
   0xb   :  { %32 = vperm.xlu0 %710, %v18_v6   ;;  %v570_v31 = vld [vmem:[%s950_s2 + $0x108] sm:$0xf]  ;;  %v552_v32 = vld [vmem:[%s950_s2 + $0x100] sm:$0xf]  ;;  %v606_v33 = vld [vmem:[%s950_s2 + $0x118] sm:$0xf] }
   0xc   :  { %v588_v34 = vld [vmem:[%s950_s2 + $0x110] sm:$0xf]  ;;  %v644_v35 = vld [vmem:[%s950_s2 + $0x98] sm:$0xf]  ;;  %v624_v36 = vld [vmem:[%s950_s2 + $0x120] sm:$0xf] }
   0xd   :  { %v667_v37 = vld [vmem:[%s950_s2 + $0xa0] sm:$0x1] }
   0xe   :  { %88 = vperm.xlu1 %711, %v70_v7   ;;  %v15_v44 = vld [vmem:[%s952_s0] sm:$0xf] }
   0xf   :  { %83 = vperm.xlu0 %710, %v69_v8   ;;  %v94_v47 = vrot.slane %v15_v44, %v856_v40  ;;  %v98_v48 = vrot.slane %v15_v44, %v859_v41  ;;  %v44_v49 = vrot.slane %v15_v44, %v862_v42  ;;  %v48_v50 = vrot.slane %v15_v44, %v865_v43 }
  0x11   :  { %v104_v53 = vrot.slane %v94_v47, %v856_v40  ;;  %v108_v54 = vrot.slane %v98_v48, %v856_v40  ;;  %v54_v55 = vrot.slane %v44_v49, %v862_v42  ;;  %v58_v56 = vrot.slane %v48_v50, %v862_v42 }
  0x12   :  { %136 = vperm.xlu1 %711, %v126_v9  }
  0x13   :  { %131 = vperm.xlu0 %710, %v125_v10  }
  0x16   :  { %146 = vperm.xlu1 %711, %v128_v11  }
  0x17   :  { %141 = vperm.xlu0 %710, %v127_v12  }
  0x1a   :  { %184 = vperm.xlu1 %711, %v174_v13  }
  0x1b   :  { %179 = vperm.xlu0 %710, %v173_v14  }
  0x1e   :  { %194 = vperm.xlu1 %711, %v176_v15  }
  0x1f   :  { %189 = vperm.xlu0 %710, %v175_v16  }
  0x22   :  { %344 = vperm.xlu1 %711, %v341_v17  }
  0x23   :  { %333 = vperm.xlu0 %710, %v330_v18  }
  0x26   :  { %367 = vperm.xlu1 %711, %v364_v19  }
  0x27   :  { %359 = vperm.xlu0 %710, %v340_v20  }
  0x2a   :  { %403 = vperm.xlu1 %711, %v400_v21  }
  0x2b   :  { %385 = vperm.xlu0 %710, %v382_v22  }
  0x2e   :  { %439 = vperm.xlu1 %711, %v436_v23  }
  0x2f   :  { %421 = vperm.xlu0 %710, %v418_v24  }
  0x32   :  { %475 = vperm.xlu1 %711, %v472_v25  }
  0x33   :  { %457 = vperm.xlu0 %710, %v454_v26  }
  0x36   :  { %511 = vperm.xlu1 %711, %v492_v27  }
  0x37   :  { %496 = vperm.xlu0 %710, %v493_v28  }
  0x3a   :  { %537 = vperm.xlu1 %711, %v534_v29  }
  0x3b   :  { %519 = vperm.xlu0 %710, %v516_v30  }
  0x3e   :  { %573 = vperm.xlu1 %711, %v570_v31  }
  0x3f   :  { %555 = vperm.xlu0 %710, %v552_v32  }
  0x42   :  { %609 = vperm.xlu1 %711, %v606_v33  }
  0x43   :  { %591 = vperm.xlu0 %710, %v588_v34  }
  0x46   :  { %647 = vperm.xlu1 %711, %v644_v35  }
  0x47   :  { %627 = vperm.xlu0 %710, %v624_v36  }
  0x4b   :  { %670 = vperm.xlu0 %710, %v667_v37  }
  0x81   :  { %v74_v45 = vpop.permute.xlu1 %73 }
  0x82   :  { %v23_v46 = vpop.permute.xlu0 %22  ;;  %v109_v59 = vmul.f32 %v104_v53, %v74_v45  ;;  %v110_v60 = vmul.f32 %v108_v54, %v74_v45 }
  0x83   :  { %v59_v61 = vmul.f32 %v54_v55, %v23_v46  ;;  %v60_v62 = vmul.f32 %v58_v56, %v23_v46 }
  0x85   :  { %v79_v51 = vpop.permute.xlu1 %78  ;;  %v117_v12 = vadd.f32 %v109_v59, %v59_v61  ;;  %v118_v13 = vadd.f32 %v110_v60, %v60_v62 }
  0x86   :  { %v28_v52 = vpop.permute.xlu0 %27  ;;  %v111_v63 = vmul.f32 %v104_v53, %v79_v51  ;;  %v112_v1 = vmul.f32 %v108_v54, %v79_v51 }
  0x87   :  { %v61_v2 = vmul.f32 %v54_v55, %v28_v52  ;;  %v62_v3 = vmul.f32 %v58_v56, %v28_v52  ;;  %v712_v52 = vld [vmem:[%s951_s1] sm:$0xff]  }
  0x89   :  { %v38_v57 = vpop.permute.xlu1 %37  ;;  %v119_v10 = vadd.f32 %v111_v63, %v61_v2  ;;  %v120_v11 = vadd.f32 %v112_v1, %v62_v3 }
  0x8a   :  { %v33_v58 = vpop.permute.xlu0 %32  ;;  %v65_v14 = vmul.f32 %v54_v55, %v38_v57  ;;  %v66_v15 = vmul.f32 %v58_v56, %v38_v57 }
  0x8b   :  { %v63_v16 = vmul.f32 %v54_v55, %v33_v58  ;;  %v64_v17 = vmul.f32 %v58_v56, %v33_v58 }
  0x8d   :  { %v89_v4 = vpop.permute.xlu1 %88 }
  0x8e   :  { %v84_v5 = vpop.permute.xlu0 %83  ;;  %v115_v6 = vmul.f32 %v104_v53, %v89_v4  ;;  %v116_v7 = vmul.f32 %v108_v54, %v89_v4 }
  0x8f   :  { %v113_v8 = vmul.f32 %v104_v53, %v84_v5  ;;  %v114_v9 = vmul.f32 %v108_v54, %v84_v5  ;;  %v713_v53 = vld [vmem:[%s951_s1 + $0x8] sm:$0xff]  }
  0x90   :  { %v123_v24 = vadd.f32 %v115_v6, %v65_v14  ;;  %v124_v25 = vadd.f32 %v116_v7, %v66_v15 }
  0x91   :  { %v137_v18 = vpop.permute.xlu1 %136  ;;  %v121_v26 = vadd.f32 %v113_v8, %v63_v16  ;;  %v122_v27 = vadd.f32 %v114_v9, %v64_v17 }
  0x92   :  { %v132_v19 = vpop.permute.xlu0 %131  ;;  %v151_v20 = vadd.f32 %v137_v18, %v119_v10  ;;  %v152_v21 = vadd.f32 %v137_v18, %v120_v11 }
  0x93   :  { %v149_v22 = vadd.f32 %v132_v19, %v117_v12  ;;  %v150_v23 = vadd.f32 %v132_v19, %v118_v13 }
  0x94   :  { %v159_v28 = vmax.f32 %v151_v20, 0.0  ;;  %v160_v31 = vmax.f32 %v152_v21, 0.0 }
  0x95   :  { %v157_v29 = vmax.f32 %v149_v22, 0.0  ;;  %v158_v30 = vmax.f32 %v150_v23, 0.0  ;;  %v147_v32 = vpop.permute.xlu1 %146  ;;  %v714_v22 = vld [vmem:[%s951_s1 + $0x10] sm:$0xff]  }
  0x96   :  { %v142_v33 = vpop.permute.xlu0 %141  ;;  %v155_v34 = vadd.f32 %v147_v32, %v123_v24  ;;  %v156_v35 = vadd.f32 %v147_v32, %v124_v25 }
  0x97   :  { %v153_v36 = vadd.f32 %v142_v33, %v121_v26  ;;  %v154_v37 = vadd.f32 %v142_v33, %v122_v27  ;;  %v170_v44 = vpack.c.bf16 %v160_v31, %v158_v30  ;;  %v169_v45 = vpack.c.bf16 %v159_v28, %v157_v29 }
  0x98   :  { %v163_v46 = vmax.f32 %v155_v34, 0.0  ;;  %v164_v47 = vmax.f32 %v156_v35, 0.0 }
  0x99   :  { %v161_v48 = vmax.f32 %v153_v36, 0.0  ;;  %v162_v49 = vmax.f32 %v154_v37, 0.0  ;;  %214 = vmatprep.subr.bf16.mxu0 %v170_v44  ;;  %v185_v58 = vpop.permute.xlu1 %184 }
  0x9a   :  { %215 = vmatpush1.bf16.msra.mxu0 %v169_v45  ;;  %v180_v54 = vpop.permute.xlu0 %179 }
  0x9b   :  { %v172_v50 = vpack.c.bf16 %v164_v47, %v162_v49  ;;  %v171_v51 = vpack.c.bf16 %v163_v46, %v161_v48  ;;  %v896_v46 = vsub.s32 4, %v853_v39 }
  0x9d   :  { %216 = vmatprep.subr.bf16.mxu0 %v172_v50  ;;  %v195_v10 = vpop.permute.xlu1 %194  ;;  %v901_v50 = vsub.s32 5, %v853_v39 }
  0x9e   :  { %217 = vmatpush1.bf16.msra.mxu0 %v171_v51  ;;  %v190_v5 = vpop.permute.xlu0 %189 }
  0xa1   :  { %704 = vmatmul.mubr.msk.bf16.vlgmr.msra.gmra.mrb[0].mxu0 %vm207_vm0, %v712_v52  ;;  %v345_v24 = vpop.permute.xlu1 %344 }
  0xa2   :  { %256 = vmatprep.mubr.bf16.mxu0 %v715_v0  ;;  %v334_v23 = vpop.permute.xlu0 %333 }
  0xa5   :  { %v368_v26 = vpop.permute.xlu1 %367 }
  0xa6   :  { %v360_v25 = vpop.permute.xlu0 %359 }
  0xa9   :  { %705 = vmatmul.mubr.msk.bf16.gmra.mrb[4].mxu0 %vm207_vm0, %v713_v53  ;;  %v404_v33 = vpop.permute.xlu1 %403 }
  0xaa   :  { %v386_v27 = vpop.permute.xlu0 %385 }
  0xad   :  { %v440_v51 = vpop.permute.xlu1 %439 }
  0xae   :  { %v422_v36 = vpop.permute.xlu0 %421 }
 0x174   :  { %v248_v55 = vpop.f32.mrb[0].mxu0 }
 0x175   :  { %v249_v56 = vadd.f32 %v248_v55, %v180_v54  ;;  %v250_v57 = vpop.f32.mrb[1].mxu0 }
 0x176   :  { %v251_v59 = vadd.f32 %v250_v57, %v180_v54  ;;  %v252_v60 = vpop.f32.mrb[2].mxu0  ;;  %v909_v57 = vsub.s32 6, %v853_v39 }
 0x177   :  { %v253_v61 = vadd.f32 %v252_v60, %v185_v58  ;;  %v254_v62 = vpop.f32.mrb[3].mxu0  ;;  %v267_v1 = vmax.f32 %v249_v56, 0.0 }
 0x178   :  { %v255_v63 = vadd.f32 %v254_v62, %v185_v58  ;;  %v268_v3 = vmax.f32 %v251_v59, 0.0  ;;  %v458_v58 = vpop.permute.xlu0 %457 }
 0x179   :  { %v269_v2 = vmax.f32 %v253_v61, 0.0 }
 0x17a   :  { %v270_v0 = vmax.f32 %v255_v63, 0.0 }
 0x17b   :  { %v277_v4 = vpack.c.bf16 %v269_v2, %v267_v1  ;;  %v915_v2 = vsub.s32 7, %v853_v39 }
 0x17c   :  { %v258_v6 = vpop.f32.mrb[4].mxu0  ;;  %v278_v7 = vpack.c.bf16 %v270_v0, %v268_v3 }
 0x17d   :  { %v259_v8 = vadd.f32 %v258_v6, %v190_v5  ;;  %v260_v9 = vpop.f32.mrb[5].mxu0 }
 0x17e   :  { %v261_v11 = vadd.f32 %v260_v9, %v190_v5  ;;  %v262_v12 = vpop.f32.mrb[6].mxu0  ;;  %289 = vmatprep.subr.bf16.mxu1 %v278_v7 }
 0x17f   :  { %v263_v13 = vadd.f32 %v262_v12, %v195_v10  ;;  %v264_v14 = vpop.f32.mrb[7].mxu0  ;;  %290 = vmatpush1.bf16.msra.mxu1 %v277_v4  ;;  %v271_v16 = vmax.f32 %v259_v8, 0.0  ;;  %v476_v8 = vpop.permute.xlu1 %475 }
 0x180   :  { %v265_v15 = vadd.f32 %v264_v14, %v195_v10  ;;  %v272_v18 = vmax.f32 %v261_v11, 0.0 }
 0x181   :  { %v273_v17 = vmax.f32 %v263_v13, 0.0 }
 0x182   :  { %v274_v19 = vmax.f32 %v265_v15, 0.0  ;;  %v497_v15 = vpop.permute.xlu0 %496 }
 0x183   :  { %v279_v20 = vpack.c.bf16 %v273_v17, %v271_v16 }
 0x184   :  { %v280_v21 = vpack.c.bf16 %v274_v19, %v272_v18 }
 0x186   :  { %291 = vmatprep.subr.bf16.mxu1 %v280_v21 }
 0x187   :  { %292 = vmatpush1.bf16.msra.mxu1 %v279_v20 }
 0x18a   :  { %707 = vmatmul.mubr.msk.bf16.vlgmr.msra.gmra.mrb[0].mxu1 %vm207_vm0, %v714_v22 }
 0x25d   :  { %v323_v28 = vpop.f32.mrb[0].mxu1 }
 0x25e   :  { %v336_v29 = vadd.f32 %v334_v23, %v323_v28  ;;  %v325_v30 = vpop.f32.mrb[1].mxu1 }
 0x25f   :  { %v337_v31 = vadd.f32 %v334_v23, %v325_v30  ;;  %v327_v32 = vpop.f32.mrb[2].mxu1  ;;  %v520_v30 = vpop.permute.xlu0 %519 }
 0x260   :  { %v338_v34 = vmax.f32 %v336_v29, 0.0  ;;  %v328_v35 = vpop.f32.mrb[3].mxu1 }
 0x261   :  { %v893_v45 = vmax.f32 %v337_v31, 0.0 }
 0x262   :  { %v350_v37 = vrot.slane %v338_v34, %v862_v42  ;;  %v373_v44 = vrot.slane %v338_v34, %v856_v40  ;;  %v391_v48 = vrot.slane %v338_v34, %v865_v43  ;;  %v409_v49 = vrot.slane %v338_v34, %v859_v41 }
 0x263   :  { %v354_v54 = vrot.slane %v893_v45, %v862_v42  ;;  %v377_v55 = vrot.slane %v893_v45, %v856_v40  ;;  %v427_v56 = vrot.slane %v338_v34, %v896_v46  ;;  %v395_v62 = vrot.slane %v893_v45, %v865_v43 }
 0x264   :  { %v355_v47 = vmul.f32 %v350_v37, %v345_v24  ;;  %v378_v53 = vmul.f32 %v373_v44, %v368_v26  ;;  %v396_v60 = vmul.f32 %v391_v48, %v386_v27  ;;  %v414_v63 = vmul.f32 %v409_v49, %v404_v33  ;;  %v556_v48 = vpop.permute.xlu0 %555 }
 0x265   :  { %v356_v61 = vmul.f32 %v354_v54, %v345_v24  ;;  %v445_v1 = vrot.slane %v338_v34, %v901_v50  ;;  %v379_v4 = vmul.f32 %v377_v55, %v368_v26  ;;  %v413_v5 = vrot.slane %v893_v45, %v859_v41 }
 0x266   :  { %v362_v52 = vadd.f32 %v360_v25, %v355_v47  ;;  %v432_v6 = vmul.f32 %v427_v56, %v422_v36  ;;  %v463_v7 = vrot.slane %v338_v34, %v909_v57  ;;  %v397_v11 = vmul.f32 %v395_v62, %v386_v27 }
 0x267   :  { %v363_v0 = vadd.f32 %v360_v25, %v356_v61  ;;  %v431_v12 = vrot.slane %v893_v45, %v896_v46  ;;  %v450_v13 = vmul.f32 %v445_v1, %v440_v51  ;;  %v481_v14 = vrot.slane %v338_v34, %v915_v2  ;;  %v512_v25 = vpop.permute.xlu1 %511 }
 0x268   :  { %v380_v59 = vadd.f32 %v378_v53, %v362_v52  ;;  %v415_v18 = vmul.f32 %v413_v5, %v404_v33  ;;  %v449_v19 = vrot.slane %v893_v45, %v901_v50  ;;  %v468_v21 = vmul.f32 %v463_v7, %v458_v58 }
 0x269   :  { %v381_v10 = vadd.f32 %v379_v4, %v363_v0  ;;  %v433_v23 = vmul.f32 %v431_v12, %v422_v36  ;;  %v486_v24 = vmul.f32 %v481_v14, %v476_v8  ;;  %v467_v29 = vrot.slane %v893_v45, %v909_v57 }
 0x26a   :  { %v398_v3 = vadd.f32 %v396_v60, %v380_v59  ;;  %v451_v28 = vmul.f32 %v449_v19, %v440_v51  ;;  %v485_v35 = vrot.slane %v893_v45, %v915_v2 }
 0x26b   :  { %v399_v17 = vadd.f32 %v397_v11, %v381_v10  ;;  %v469_v33 = vmul.f32 %v467_v29, %v458_v58  ;;  %v538_v37 = vpop.permute.xlu1 %537 }
 0x26c   :  { %v416_v9 = vadd.f32 %v414_v63, %v398_v3  ;;  %v487_v52 = vmul.f32 %v485_v35, %v476_v8  ;;  %v592_v63 = vpop.permute.xlu0 %591 }
 0x26d   :  { %v417_v22 = vadd.f32 %v415_v18, %v399_v17 }
 0x26e   :  { %v434_v16 = vadd.f32 %v432_v6, %v416_v9 }
 0x26f   :  { %v435_v27 = vadd.f32 %v433_v23, %v417_v22  ;;  %v574_v58 = vpop.permute.xlu1 %573 }
 0x270   :  { %v452_v20 = vadd.f32 %v450_v13, %v434_v16 }
 0x271   :  { %v453_v32 = vadd.f32 %v451_v28, %v435_v27 }
 0x272   :  { %v470_v26 = vadd.f32 %v468_v21, %v452_v20 }
 0x273   :  { %v471_v47 = vadd.f32 %v469_v33, %v453_v32  ;;  %v610_v12 = vpop.permute.xlu1 %609 }
 0x274   :  { %v488_v31 = vadd.f32 %v486_v24, %v470_v26 }
 0x275   :  { %v489_v56 = vadd.f32 %v487_v52, %v471_v47 }
 0x276   :  { %v490_v34 = vmax.f32 %v488_v31, 0.0 }
 0x277   :  { %v491_v61 = vmax.f32 %v489_v56, 0.0  ;;  %v648_v32 = vpop.permute.xlu1 %647  ;;  %v716_v56 = vmov 1966171168  }
 0x278   :  { %v502_v44 = vrot.slane %v490_v34, %v862_v42  ;;  %v525_v36 = vrot.slane %v490_v34, %v856_v40  ;;  %v543_v51 = vrot.slane %v490_v34, %v865_v43  ;;  %v561_v55 = vrot.slane %v490_v34, %v859_v41 }
 0x279   :  { %v579_v45 = vrot.slane %v490_v34, %v896_v46  ;;  %v597_v62 = vrot.slane %v490_v34, %v901_v50  ;;  %v506_v0 = vrot.slane %v491_v61, %v862_v42  ;;  %v529_v4 = vrot.slane %v491_v61, %v856_v40  ;;  %v628_v42 = vpop.permute.xlu0 %627 }
 0x27a   :  { %v507_v49 = vmul.f32 %v502_v44, %v497_v15  ;;  %v530_v54 = vmul.f32 %v525_v36, %v520_v30  ;;  %v548_v60 = vmul.f32 %v543_v51, %v538_v37  ;;  %v566_v3 = vmul.f32 %v561_v55, %v556_v48 }
 0x27b   :  { %v615_v5 = vrot.slane %v490_v34, %v909_v57  ;;  %v584_v7 = vmul.f32 %v579_v45, %v574_v58  ;;  %v508_v8 = vmul.f32 %v506_v0, %v497_v15  ;;  %v547_v9 = vrot.slane %v491_v61, %v865_v43 }
 0x27c   :  { %v514_v53 = vadd.f32 %v512_v25, %v507_v49  ;;  %v602_v10 = vmul.f32 %v597_v62, %v592_v63  ;;  %v633_v11 = vrot.slane %v490_v34, %v915_v2  ;;  %v531_v16 = vmul.f32 %v529_v4, %v520_v30 }
 0x27d   :  { %v515_v14 = vadd.f32 %v512_v25, %v508_v8  ;;  %v565_v17 = vrot.slane %v491_v61, %v859_v41  ;;  %v620_v18 = vmul.f32 %v615_v5, %v610_v12  ;;  %v549_v20 = vmul.f32 %v547_v9, %v538_v37  ;;  %v671_v62 = vpop.permute.xlu0 %670 }
 0x27e   :  { %v532_v59 = vadd.f32 %v530_v54, %v514_v53  ;;  %v583_v21 = vrot.slane %v491_v61, %v896_v46  ;;  %v638_v22 = vmul.f32 %v633_v11, %v628_v42  ;;  %v601_v24 = vrot.slane %v491_v61, %v901_v50 }
 0x27f   :  { %v533_v40 = vadd.f32 %v531_v16, %v515_v14  ;;  %v567_v43 = vmul.f32 %v565_v17, %v556_v48  ;;  %v619_v25 = vrot.slane %v491_v61, %v909_v57  ;;  %v637_v31 = vrot.slane %v491_v61, %v915_v2 }
 0x280   :  { %v550_v1 = vadd.f32 %v548_v60, %v532_v59  ;;  %v585_v28 = vmul.f32 %v583_v21, %v574_v58  ;;  %v603_v30 = vmul.f32 %v601_v24, %v592_v63  ;;  %v679_v58 = vunpack.c.l.s4 %v716_v56 }
 0x281   :  { %v551_v23 = vadd.f32 %v549_v20, %v533_v40  ;;  %v621_v33 = vmul.f32 %v619_v25, %v610_v12  ;;  %v639_v44 = vmul.f32 %v637_v31, %v628_v42 }
 0x282   :  { %v568_v6 = vadd.f32 %v566_v3, %v550_v1  ;;  %v680_v61 = vunpack.c.0.s8 %v679_v58 }
 0x283   :  { %v569_v27 = vadd.f32 %v567_v43, %v551_v23 }
 0x284   :  { %v586_v13 = vadd.f32 %v584_v7, %v568_v6  ;;  %v683_v0 = vsub.s32 %v680_v61, %v853_v39 }
 0x285   :  { %v587_v41 = vadd.f32 %v585_v28, %v569_v27 }
 0x286   :  { %v604_v19 = vadd.f32 %v602_v10, %v586_v13 }
 0x287   :  { %v605_v46 = vadd.f32 %v603_v30, %v587_v41 }
 0x288   :  { %v622_v15 = vadd.f32 %v620_v18, %v604_v19 }
 0x289   :  { %v623_v37 = vadd.f32 %v621_v33, %v605_v46 }
 0x28a   :  { %v640_v26 = vadd.f32 %v638_v22, %v622_v15 }
 0x28b   :  { %v641_v50 = vadd.f32 %v639_v44, %v623_v37 }
 0x28c   :  { %v642_v29 = vmax.f32 %v640_v26, 0.0 }
 0x28d   :  { %v643_v48 = vmax.f32 %v641_v50, 0.0 }
 0x28e   :  { %v650_v34 = vmul.f32 %v648_v32, %v642_v29 }
 0x28f   :  { %v651_v51 = vmul.f32 %v648_v32, %v643_v48 }
 0x290   :  { %v653_v35 = vsel %vm652_vm1, %v650_v34, 0.0 }
 0x291   :  { %v654_v36 = vrot.slane %v653_v35, 4  ;;  %v660_v52 = vsel %vm652_vm1, %v651_v51, 0.0 }
 0x292   :  { %v661_v53 = vrot.slane %v660_v52, 4 }
 0x293   :  { %v655_v47 = vadd.f32 %v654_v36, %v653_v35 }
 0x294   :  { %v662_v55 = vadd.f32 %v661_v53, %v660_v52 }
 0x295   :  { %v656_v49 = vrot.slane %v655_v47, 2 }
 0x296   :  { %v663_v2 = vrot.slane %v662_v55, 2 }
 0x297   :  { %v657_v57 = vadd.f32 %v656_v49, %v655_v47 }
 0x298   :  { %v664_v60 = vadd.f32 %v663_v2, %v662_v55 }
 0x299   :  { %v658_v54 = vrot.slane %v657_v57, 1 }
 0x29a   :  { %v665_v45 = vrot.slane %v664_v60, 1 }
 0x29b   :  { %v659_v59 = vadd.f32 %v658_v54, %v657_v57 }
 0x29c   :  { %v666_v1 = vadd.f32 %v665_v45, %v664_v60 }
 0x29d   :  { %v673_v63 = vadd.f32 %v671_v62, %v659_v59 }
 0x29e   :  { %v674_v3 = vadd.f32 %v671_v62, %v666_v1 }
 0x2a0   :  { %v677_v4 = vcombine.low %v673_v63, %v674_v3 }
 0x2a2   :  { %v684_v5 = vrot.slane %v677_v4, %v683_v0 }
 0x2a4   :  { %v691_v6 = vrot.slane %v684_v5, %v683_v0 }
 0x2a6   :  { %697 = vst.msk [vmem:[%s953_s3] sm:$0x3] %vm695_vm2, %v691_v6 }

</bundles_post_ra>
